<compile_context>
chip_gen: v7x
topology: tpu7x:2x2x1
jax: 0.10.0
libtpu: 0.0.40
codegen_flags: <defaults>
</compile_context>

<pallas_src>
import functools

import jax
import jax.numpy as jnp
from jax.experimental import pallas as pl
from jax.experimental.pallas import tpu as pltpu

IN_FEATURES = 68   # 2 * sum([8,2,2,2,2,1]) * 2 == 68, from board_to_feature_vector
HIDDEN = 32
OUT_FEATURES = 1


def _round_up(n, m):
    return ((n + m - 1) // m) * m


def valuenet_kernel(x_ref, w1t_ref, b1_ref, w2t_ref, b2_ref, o_ref):
    # fc1: (tm, 68) @ (68, 32) -> (tm, 32), f32 accumulation on the MXU.
    h = jnp.dot(x_ref[...], w1t_ref[...], preferred_element_type=jnp.float32)
    h = jnp.maximum(h + b1_ref[...], 0.0)             # bias broadcast + ReLU (VPU)
    # fc2: (tm, 32) @ (32, 1) -> (tm, 1): already the final (B, 1) orientation.
    y = jnp.dot(h, w2t_ref[...], preferred_element_type=jnp.float32) + b2_ref[...]
    o_ref[...] = jnp.tanh(y).astype(o_ref.dtype)      # tanh in f32 (EUP)


@functools.partial(jax.jit, static_argnames=("tm",))
def valuenet_forward(x, w1, b1, w2, b2, *, tm=8192):
    """Forward pass.

    x:  (B, 68)  feature vectors (f32, or bf16 if the producer already emits bf16)
    w1: (32, 68) fc1 weight (PyTorch (out, in) layout), b1: (32,)
    w2: (1, 32)  fc2 weight (PyTorch (out, in) layout), b2: (1,)
    returns (B, 1) f32 = tanh(relu(x @ w1.T + b1) @ w2.T + b2)
    """
    B = x.shape[0]

    # Batch tile: multiple of 128; keep >= 2 grid steps when B allows so the
    # "parallel" batch axis can actually be split across v7x's two TensorCores.
    tm = max(128, _round_up(tm, 128))
    tm = min(tm, max(128, _round_up(pl.cdiv(B, 2), 128)))
    grid = (pl.cdiv(B, tm),)

    # One-time tiny host-side layout ops (weights are ~8.7 KB total); x is untouched.
    w1t = w1.T.astype(jnp.float32)                                   # (68, 32)
    b1_in = b1.reshape(1, HIDDEN).astype(jnp.float32)                # (1, 32)
    w2t = w2.reshape(OUT_FEATURES, HIDDEN).T.astype(jnp.float32)     # (32, 1)
    b2_in = b2.reshape(1, OUT_FEATURES).astype(jnp.float32)          # (1, 1)

    resident = lambda i: (0, 0)  # weights/biases stay VMEM-resident across all grid steps

    out = pl.pallas_call(
        valuenet_kernel,
        out_shape=jax.ShapeDtypeStruct((B, OUT_FEATURES), jnp.float32),
        grid=grid,
        in_specs=[
            # Batch-tiled, double-buffered input stream in natural (B, 68) layout.
            pl.BlockSpec((tm, IN_FEATURES), lambda i: (i, 0)),
            pl.BlockSpec((IN_FEATURES, HIDDEN), resident),
            pl.BlockSpec((1, HIDDEN), resident),
            pl.BlockSpec((HIDDEN, OUT_FEATURES), resident),
            pl.BlockSpec((1, OUT_FEATURES), resident),
        ],
        out_specs=pl.BlockSpec((tm, OUT_FEATURES), lambda i: (i, 0)),
        compiler_params=pltpu.CompilerParams(
            # Batch tiles are independent -> shard grid across v7x's 2 TensorCores.
            dimension_semantics=("parallel",),
            # ~16 MiB of double-buffered (tm,68)+(tm,1) f32 tiles at tm=8192;
            # exceed v5e's 16 MiB default scoped limit, comfortably under 48 MiB
            # everywhere (v7x physical VMEM is 64 MiB).
            vmem_limit_bytes=48 * 1024 * 1024,
        ),
    )(x, w1t, b1_in, w2t, b2_in)
    return out


def init_params(key):
    """Deterministic init mirroring nn.Linear (weight stored as (out_features, in_features))."""
    k1, k2, k3, k4 = jax.random.split(key, 4)
    lim1 = 1.0 / jnp.sqrt(jnp.float32(IN_FEATURES))
    lim2 = 1.0 / jnp.sqrt(jnp.float32(HIDDEN))
    w1 = jax.random.uniform(k1, (HIDDEN, IN_FEATURES), jnp.float32, -lim1, lim1)
    b1 = jax.random.uniform(k2, (HIDDEN,), jnp.float32, -lim1, lim1)
    w2 = jax.random.uniform(k3, (OUT_FEATURES, HIDDEN), jnp.float32, -lim2, lim2)
    b2 = jax.random.uniform(k4, (OUT_FEATURES,), jnp.float32, -lim2, lim2)
    return w1, b1, w2, b2


def _ref_forward(x, w1, b1, w2, b2):
    """Pure-JAX reference of the PyTorch forward (y = x @ W.T + b)."""
    return jnp.tanh(jnp.maximum(x @ w1.T + b1, 0.0) @ w2.T + b2)


if __name__ == "__main__":
    key = jax.random.PRNGKey(0)
    kx, kx2, kp = jax.random.split(key, 3)

    # Batch of 8 synthetic "board feature vectors" (the real module builds these from a
    # python-chess board on the host; values lie in [-1, 1] after normalisation).
    # TODO(synk): board_to_feature_vector is host-side python-chess glue, not kernel work.
    B = 8
    x = jax.random.uniform(kx, (B, IN_FEATURES), jnp.float32, -1.0, 1.0)
    w1, b1, w2, b2 = init_params(kp)

    ref = _ref_forward(x, w1, b1, w2, b2)
    out = jax.block_until_ready(valuenet_forward(x, w1, b1, w2, b2))
    assert out.shape == (B, OUT_FEATURES)
    assert jnp.allclose(out, ref, atol=1e-5, rtol=1e-5)

    # Second check: multi-step grid with a ragged last block (300 rows, tm=128 -> 3 steps),
    # exercising the cdiv-grid clipping path.
    B2 = 300
    x2 = jax.random.uniform(kx2, (B2, IN_FEATURES), jnp.float32, -1.0, 1.0)
    ref2 = _ref_forward(x2, w1, b1, w2, b2)
    out2 = jax.block_until_ready(valuenet_forward(x2, w1, b1, w2, b2, tm=128))
    assert out2.shape == (B2, OUT_FEATURES)
    assert jnp.allclose(out2, ref2, atol=1e-5, rtol=1e-5)

    print("KERNEL_OK")
</pallas_src>

<mosaic_0001>
module attributes {stable_mosaic.version = 11 : i64} {
  func.func @valuenet_kernel(%arg0: i32, %arg1: memref<128x68xf32, #tpu.memory_space<vmem>>, %arg2: memref<68x32xf32, #tpu.memory_space<vmem>>, %arg3: memref<1x32xf32, #tpu.memory_space<vmem>>, %arg4: memref<32x1xf32, #tpu.memory_space<vmem>>, %arg5: memref<1x1xf32, #tpu.memory_space<vmem>>, %arg6: memref<128x1xf32, #tpu.memory_space<vmem>>) attributes {dimension_semantics = [#tpu.dimension_semantics<parallel>], iteration_bounds = array<i64: 1>, scalar_prefetch = 0 : i64, scratch_operands = 0 : i64, tpu.core_type = #tpu.core_type<tc>, window_params = [{transform_indices = @transform_0, window_bounds = array<i64: 128, 68>}, {pipeline_mode = #tpu.pipeline_mode<synchronous>, transform_indices = @transform_1, window_bounds = array<i64: 68, 32>}, {pipeline_mode = #tpu.pipeline_mode<synchronous>, transform_indices = @transform_2, window_bounds = array<i64: 1, 32>}, {pipeline_mode = #tpu.pipeline_mode<synchronous>, transform_indices = @transform_3, window_bounds = array<i64: 32, 1>}, {pipeline_mode = #tpu.pipeline_mode<synchronous>, transform_indices = @transform_4, window_bounds = array<i64: 1, 1>}, {transform_indices = @transform_5, window_bounds = array<i64: 128, 1>}]} {
    %c0 = arith.constant 0 : index
    %c0_0 = arith.constant 0 : index
    %0 = vector.load %arg1[%c0, %c0_0] : memref<128x68xf32, #tpu.memory_space<vmem>>, vector<128x68xf32>
    %c0_1 = arith.constant 0 : index
    %c0_2 = arith.constant 0 : index
    %1 = vector.load %arg2[%c0_1, %c0_2] : memref<68x32xf32, #tpu.memory_space<vmem>>, vector<68x32xf32>
    %cst = arith.constant dense<0.000000e+00> : vector<128x32xf32>
    %2 = tpu.matmul %0, %1, %cst {dimension_numbers = #tpu.dot_dimension_numbers<[1], [0], [0], [1], [0, 0, 1, 1], [], []>} : vector<128x68xf32>, vector<68x32xf32>, vector<128x32xf32> -> vector<128x32xf32>
    %c0_3 = arith.constant 0 : index
    %c0_4 = arith.constant 0 : index
    %3 = vector.load %arg3[%c0_3, %c0_4] : memref<1x32xf32, #tpu.memory_space<vmem>>, vector<1x32xf32>
    %4 = vector.broadcast %3 : vector<1x32xf32> to vector<128x32xf32>
    %5 = arith.addf %2, %4 : vector<128x32xf32>
    %cst_5 = arith.constant 0.000000e+00 : f32
    %6 = vector.broadcast %cst_5 : f32 to vector<128x32xf32>
    %7 = arith.maximumf %5, %6 : vector<128x32xf32>
    %c0_6 = arith.constant 0 : index
    %c0_7 = arith.constant 0 : index
    %8 = vector.load %arg4[%c0_6, %c0_7] : memref<32x1xf32, #tpu.memory_space<vmem>>, vector<32x1xf32>
    %cst_8 = arith.constant dense<0.000000e+00> : vector<128x1xf32>
    %9 = tpu.matmul %7, %8, %cst_8 {dimension_numbers = #tpu.dot_dimension_numbers<[1], [0], [0], [1], [0, 0, 1, 1], [], []>} : vector<128x32xf32>, vector<32x1xf32>, vector<128x1xf32> -> vector<128x1xf32>
    %c0_9 = arith.constant 0 : index
    %c0_10 = arith.constant 0 : index
    %10 = vector.load %arg5[%c0_9, %c0_10] : memref<1x1xf32, #tpu.memory_space<vmem>>, vector<1x1xf32>
    %11 = vector.broadcast %10 : vector<1x1xf32> to vector<128x1xf32>
    %12 = arith.addf %9, %11 : vector<128x1xf32>
    %13 = math.tanh %12 : vector<128x1xf32>
    %c0_11 = arith.constant 0 : index
    %c0_12 = arith.constant 0 : index
    %14 = vector.load %arg6[%c0_11, %c0_12] : memref<128x1xf32, #tpu.memory_space<vmem>>, vector<128x1xf32>
    tpu.vector_store %arg6[%c0_11, %c0_12], %13 {strides = array<i32>} : memref<128x1xf32, #tpu.memory_space<vmem>>, vector<128x1xf32>,
    return
  }
  func.func @transform_0(%arg0: i32) -> (i32, i32) {
    %c0_i32 = arith.constant 0 : i32
    %c0_i32_0 = arith.constant 0 : i32
    return %arg0, %c0_i32 : i32, i32
  }
  func.func @transform_1(%arg0: i32) -> (i32, i32) {
    %c0_i32 = arith.constant 0 : i32
    %c0_i32_0 = arith.constant 0 : i32
    %c0_i32_1 = arith.constant 0 : i32
    return %c0_i32, %c0_i32_0 : i32, i32
  }
  func.func @transform_2(%arg0: i32) -> (i32, i32) {
    %c0_i32 = arith.constant 0 : i32
    %c0_i32_0 = arith.constant 0 : i32
    %c0_i32_1 = arith.constant 0 : i32
    return %c0_i32, %c0_i32_0 : i32, i32
  }
  func.func @transform_3(%arg0: i32) -> (i32, i32) {
    %c0_i32 = arith.constant 0 : i32
    %c0_i32_0 = arith.constant 0 : i32
    %c0_i32_1 = arith.constant 0 : i32
    return %c0_i32, %c0_i32_0 : i32, i32
  }
  func.func @transform_4(%arg0: i32) -> (i32, i32) {
    %c0_i32 = arith.constant 0 : i32
    %c0_i32_0 = arith.constant 0 : i32
    %c0_i32_1 = arith.constant 0 : i32
    return %c0_i32, %c0_i32_0 : i32, i32
  }
  func.func @transform_5(%arg0: i32) -> (i32, i32) {
    %c0_i32 = arith.constant 0 : i32
    %c0_i32_0 = arith.constant 0 : i32
    return %arg0, %c0_i32 : i32, i32
  }
}

</mosaic_0001>

<bundles_post_ra>
// kernel: valuenet_forward.1
= control target key start
LH: loop header
LB: loop body
LE: loop exit
PB: predicated region body
PF: predicated region fallthrough
CT: control target
= control target key end

     0   :  { %s914_s0 = inlined_call_operand.vmem [shape: f32[8,68], index: 0, kind: input, shape index: {}]   ;;  %s915_s1 = inlined_call_operand.vmem [shape: f32[68,32], index: 1, kind: input, shape index: {}]   ;;  %s916_s2 = inlined_call_operand.vmem [shape: f32[1,32], index: 2, kind: input, shape index: {}]   ;;  %s917_s3 = inlined_call_operand.vmem [shape: f32[32,1], index: 3, kind: input, shape index: {}]   ;;  %s918_s4 = inlined_call_operand.<no memory space> [shape: f32[1,1], index: 4, kind: input, shape index: {}]   ;;  %s919_s5 = inlined_call_operand.vmem [shape: f32[8,1], index: 5, kind: output, shape index: {}]  }
   0x1   :  { %v10_v0 = vstv %s918_s4 }
   0x2   :  { %11 = vst [vmem:[#allocation2] sm:$0x1] %v10_v0 }
   0x3   :  { %v38_v1 = vld [vmem:[%s915_s1] sm:$0xff]  ;;  %v39_v2 = vld [vmem:[%s915_s1 + $0x8] sm:$0xff]  ;;  %v40_v3 = vld [vmem:[%s915_s1 + $0x10] sm:$0xff]  ;;  %vm54_vm0 = vcmask 556032   ;;  %vm103_vm1 = vcmask 1043456   ;;  %vm279_vm2 = vcmask 261120  }
   0x4   :  { %v700_v4 = vpack.c.bf16 %v39_v2, %v38_v1  ;;  %v41_v5 = vld [vmem:[%s915_s1 + $0x18] sm:$0xff]  ;;  %v42_v7 = vld [vmem:[%s915_s1 + $0x20] sm:$0xff]  ;;  %v43_v8 = vld [vmem:[%s915_s1 + $0x28] sm:$0xff]  ;;  %vm489_vm3 = vcmask 7168  }
   0x5   :  { %v704_v6 = vpack.c.bf16 %v41_v5, %v40_v3  ;;  %v22_v9 = vld [vmem:[%s914_s0] sm:$0xff]  ;;  %v708_v10 = vpack.c.bf16 %v43_v8, %v42_v7  ;;  %v44_v11 = vld [vmem:[%s915_s1 + $0x30] sm:$0xff]  ;;  %v45_v12 = vld [vmem:[%s915_s1 + $0x38] sm:$0xff] }
   0x6   :  { %701 = vmatprep.subr.bf16.mxu0 %v700_v4  ;;  %644 = vmatprep.mubr.msk.f32.mxu0 %vm54_vm0, %v22_v9  ;;  %v268_v13 = vld [vmem:[%s917_s3] sm:$0xff]  ;;  %v269_v14 = vld [vmem:[%s917_s3 + $0x8] sm:$0xff]  ;;  %v712_v15 = vpack.c.bf16 %v45_v12, %v44_v11  ;;  %v24_v19 = vld [vmem:[%s914_s0 + $0x10] sm:$0xff] }
   0x7   :  { %703 = vmatpush3.bf16.msra.mxu0 %v700_v4  ;;  %v716_v16 = vpack.c.bf16 %v269_v14, %v268_v13  ;;  %v46_v17 = vld [vmem:[%s915_s1 + $0x40] sm:$0xf]  ;;  %v23_v18 = vld [vmem:[%s914_s0 + $0x8] sm:$0xff]  ;;  %v25_v20 = vld [vmem:[%s914_s0 + $0x18] sm:$0xff] }
   0x8   :  { %705 = vmatprep.subr.bf16.mxu0 %v704_v6  ;;  %v26_v21 = vld [vmem:[%s914_s0 + $0x20] sm:$0xff]  ;;  %v27_v22 = vld [vmem:[%s914_s0 + $0x28] sm:$0xff]  ;;  %v28_v23 = vld [vmem:[%s914_s0 + $0x30] sm:$0xff] }
   0x9   :  { %717 = vmatprep.subr.bf16.mxu1 %v716_v16  ;;  %v29_v24 = vld [vmem:[%s914_s0 + $0x38] sm:$0xff]  ;;  %v30_v25 = vld [vmem:[%s914_s0 + $0x40] sm:$0xff]  ;;  %v31_v26 = vld [vmem:[%s914_s0 + $0x48] sm:$0xff] }
   0xa   :  { %719 = vmatpush3.bf16.msra.mxu1 %v716_v16  ;;  %v32_v27 = vld [vmem:[%s914_s0 + $0x50] sm:$0xff]  ;;  %v33_v28 = vld [vmem:[%s914_s0 + $0x58] sm:$0xff]  ;;  %v34_v29 = vld [vmem:[%s914_s0 + $0x60] sm:$0xff] }
   0xb   :  { %707 = vmatpush3.bf16.msra.mxu0 %v704_v6  ;;  %v35_v30 = vld [vmem:[%s914_s0 + $0x68] sm:$0xff]  ;;  %v36_v31 = vld [vmem:[%s914_s0 + $0x70] sm:$0xff]  ;;  %v37_v32 = vld [vmem:[%s914_s0 + $0x78] sm:$0xff] }
   0xc   :  { %709 = vmatprep.subr.bf16.mxu0 %v708_v10  ;;  %v270_v33 = vld [vmem:[%s917_s3 + $0x10] sm:$0xff]  ;;  %v271_v34 = vld [vmem:[%s917_s3 + $0x18] sm:$0xff]  ;;  %v546_v36 = vld [vmem:[%s916_s2] ss:$0 sm:$0xff] }
   0xd   :  { %v720_v35 = vpack.c.bf16 %v271_v34, %v270_v33 }
   0xf   :  { %711 = vmatpush3.bf16.msra.mxu0 %v708_v10  ;;  %721 = vmatprep.subr.bf16.mxu1 %v720_v35 }
  0x10   :  { %713 = vmatprep.subr.bf16.mxu0 %v712_v15  ;;  %723 = vmatpush3.bf16.msra.mxu1 %v720_v35 }
  0x13   :  { %715 = vmatpush3.bf16.msra.mxu0 %v712_v15 }
  0x14   :  { %642 = vmatprep.subr.msk.mxu0 %vm103_vm1, %v46_v17 }
  0x17   :  { %643 = vmatpush3.msk.msra.mxu0 %vm103_vm1, %v46_v17 }
  0x18   :  { %645 = vmatmul.mubr.msk.f32.vlgmr.msra.gmra.mrb[0].mxu0 %vm54_vm0, %v23_v18 }
  0x19   :  { %647 = vmatprep.mubr.msk.f32.mxu0 %vm54_vm0, %v24_v19 }
  0x1c   :  { %648 = vmatmul.mubr.msk.f32.gmra.mrb[2].mxu0 %vm54_vm0, %v25_v20 }
  0x1d   :  { %650 = vmatprep.mubr.msk.f32.mxu0 %vm54_vm0, %v26_v21  ;;  %v564_v21 = vld [vmem:[#allocation2] ss:$0 sm:$0xff] }
  0x20   :  { %651 = vmatmul.mubr.msk.f32.gmra.mrb[4].mxu0 %vm54_vm0, %v27_v22 }
  0x21   :  { %653 = vmatprep.mubr.msk.f32.mxu0 %vm54_vm0, %v28_v23 }
  0x24   :  { %654 = vmatmul.mubr.msk.f32.gmra.mrb[6].mxu0 %vm54_vm0, %v29_v24 }
  0x25   :  { %656 = vmatprep.mubr.msk.f32.mxu0 %vm54_vm0, %v30_v25 }
  0x28   :  { %657 = vmatmul.mubr.msk.f32.gmra.mrb[8].mxu0 %vm54_vm0, %v31_v26 }
  0x29   :  { %659 = vmatprep.mubr.msk.f32.mxu0 %vm54_vm0, %v32_v27 }
  0x2c   :  { %660 = vmatmul.mubr.msk.f32.gmra.mrb[10].mxu0 %vm54_vm0, %v33_v28 }
  0x2d   :  { %662 = vmatprep.mubr.msk.f32.mxu0 %vm54_vm0, %v34_v29 }
  0x30   :  { %663 = vmatmul.mubr.msk.f32.gmra.mrb[12].mxu0 %vm54_vm0, %v35_v30 }
  0x31   :  { %665 = vmatprep.mubr.msk.f32.mxu0 %vm54_vm0, %v36_v31 }
  0x34   :  { %666 = vmatmul.mubr.msk.f32.gmra.mrb[14].mxu0 %vm54_vm0, %v37_v32 }
  0xeb   :  { %v646_v37 = vpop.f32.mrb[0].mxu0 }
  0xec   :  { %v179_v38 = vadd.f32 %v646_v37, %v546_v36  ;;  %v173_v39 = vpop.f32.mrb[1].mxu0 }
  0xed   :  { %v174_v40 = vadd.f32 %v546_v36, %v173_v39 }
  0xee   :  { %v253_v43 = vmax.f32 %v179_v38, 0.0 }
  0xef   :  { %v252_v41 = vmax.f32 %v174_v40, 0.0  ;;  %v649_v42 = vpop.f32.mrb[2].mxu0 }
  0xf0   :  { %v189_v44 = vadd.f32 %v649_v42, %v546_v36  ;;  %v183_v45 = vpop.f32.mrb[3].mxu0 }
  0xf1   :  { %v184_v46 = vadd.f32 %v546_v36, %v183_v45  ;;  %676 = vmatprep.mubr.msk.f32.mxu1 %vm279_vm2, %v252_v41 }
  0xf2   :  { %677 = vmatmul.mubr.msk.f32.vlgmr.msra.gmra.mrb[0].mxu1 %vm279_vm2, %v253_v43  ;;  %v255_v49 = vmax.f32 %v189_v44, 0.0 }
  0xf3   :  { %v254_v47 = vmax.f32 %v184_v46, 0.0  ;;  %v652_v48 = vpop.f32.mrb[4].mxu0 }
  0xf4   :  { %v199_v50 = vadd.f32 %v652_v48, %v546_v36  ;;  %v193_v51 = vpop.f32.mrb[5].mxu0 }
  0xf5   :  { %v194_v52 = vadd.f32 %v546_v36, %v193_v51  ;;  %679 = vmatprep.mubr.msk.f32.mxu1 %vm279_vm2, %v254_v47 }
  0xf6   :  { %680 = vmatmul.mubr.msk.f32.gmra.mrb[2].mxu1 %vm279_vm2, %v255_v49  ;;  %v257_v55 = vmax.f32 %v199_v50, 0.0 }
  0xf7   :  { %v256_v53 = vmax.f32 %v194_v52, 0.0  ;;  %v655_v54 = vpop.f32.mrb[6].mxu0 }
  0xf8   :  { %v209_v56 = vadd.f32 %v655_v54, %v546_v36  ;;  %v203_v57 = vpop.f32.mrb[7].mxu0 }
  0xf9   :  { %v204_v58 = vadd.f32 %v546_v36, %v203_v57  ;;  %682 = vmatprep.mubr.msk.f32.mxu1 %vm279_vm2, %v256_v53 }
  0xfa   :  { %683 = vmatmul.mubr.msk.f32.gmra.mrb[4].mxu1 %vm279_vm2, %v257_v55  ;;  %v259_v61 = vmax.f32 %v209_v56, 0.0 }
  0xfb   :  { %v258_v59 = vmax.f32 %v204_v58, 0.0  ;;  %v658_v60 = vpop.f32.mrb[8].mxu0 }
  0xfc   :  { %v219_v62 = vadd.f32 %v658_v60, %v546_v36  ;;  %v213_v63 = vpop.f32.mrb[9].mxu0 }
  0xfd   :  { %v214_v0 = vadd.f32 %v546_v36, %v213_v63  ;;  %685 = vmatprep.mubr.msk.f32.mxu1 %vm279_vm2, %v258_v59 }
  0xfe   :  { %686 = vmatmul.mubr.msk.f32.gmra.mrb[6].mxu1 %vm279_vm2, %v259_v61  ;;  %v261_v3 = vmax.f32 %v219_v62, 0.0 }
  0xff   :  { %v260_v1 = vmax.f32 %v214_v0, 0.0  ;;  %v661_v2 = vpop.f32.mrb[10].mxu0 }
 0x100   :  { %v229_v4 = vadd.f32 %v661_v2, %v546_v36  ;;  %v223_v5 = vpop.f32.mrb[11].mxu0 }
 0x101   :  { %v224_v6 = vadd.f32 %v546_v36, %v223_v5  ;;  %688 = vmatprep.mubr.msk.f32.mxu1 %vm279_vm2, %v260_v1 }
 0x102   :  { %689 = vmatmul.mubr.msk.f32.gmra.mrb[8].mxu1 %vm279_vm2, %v261_v3  ;;  %v263_v9 = vmax.f32 %v229_v4, 0.0 }
 0x103   :  { %v262_v7 = vmax.f32 %v224_v6, 0.0  ;;  %v664_v8 = vpop.f32.mrb[12].mxu0 }
 0x104   :  { %v239_v10 = vadd.f32 %v664_v8, %v546_v36  ;;  %v233_v11 = vpop.f32.mrb[13].mxu0 }
 0x105   :  { %v234_v12 = vadd.f32 %v546_v36, %v233_v11  ;;  %691 = vmatprep.mubr.msk.f32.mxu1 %vm279_vm2, %v262_v7 }
 0x106   :  { %692 = vmatmul.mubr.msk.f32.gmra.mrb[10].mxu1 %vm279_vm2, %v263_v9  ;;  %v265_v15 = vmax.f32 %v239_v10, 0.0 }
 0x107   :  { %v264_v13 = vmax.f32 %v234_v12, 0.0  ;;  %v667_v14 = vpop.f32.mrb[14].mxu0 }
 0x108   :  { %v249_v16 = vadd.f32 %v667_v14, %v546_v36  ;;  %v243_v17 = vpop.f32.mrb[15].mxu0 }
 0x109   :  { %v244_v18 = vadd.f32 %v546_v36, %v243_v17  ;;  %694 = vmatprep.mubr.msk.f32.mxu1 %vm279_vm2, %v264_v13 }
 0x10a   :  { %695 = vmatmul.mubr.msk.f32.gmra.mrb[12].mxu1 %vm279_vm2, %v265_v15  ;;  %v267_v20 = vmax.f32 %v249_v16, 0.0 }
 0x10b   :  { %v266_v19 = vmax.f32 %v244_v18, 0.0 }
 0x10d   :  { %697 = vmatprep.mubr.msk.f32.mxu1 %vm279_vm2, %v266_v19 }
 0x10e   :  { %698 = vmatmul.mubr.msk.f32.gmra.mrb[14].mxu1 %vm279_vm2, %v267_v20 }
 0x1c5   :  { %v678_v22 = vpop.f32.mrb[0].mxu1 }
 0x1c6   :  { %v400_v23 = vadd.f32 %v678_v22, %v564_v21  ;;  %v394_v24 = vpop.f32.mrb[1].mxu1 }
 0x1c7   :  { %v395_v25 = vadd.f32 %v564_v21, %v394_v24 }
 0x1c8   :  { %724 = vtanh.f32 %v400_v23 }
 0x1c9   :  { %726 = vtanh.f32 %v395_v25  ;;  %v681_v26 = vpop.f32.mrb[2].mxu1 }
 0x1ca   :  { %v410_v27 = vadd.f32 %v681_v26, %v564_v21  ;;  %v404_v28 = vpop.f32.mrb[3].mxu1 }
 0x1cb   :  { %v405_v29 = vadd.f32 %v564_v21, %v404_v28 }
 0x1cc   :  { %728 = vtanh.f32 %v410_v27 }
 0x1cd   :  { %730 = vtanh.f32 %v405_v29  ;;  %v684_v30 = vpop.f32.mrb[4].mxu1 }
 0x1ce   :  { %v420_v31 = vadd.f32 %v684_v30, %v564_v21  ;;  %v414_v32 = vpop.f32.mrb[5].mxu1 }
 0x1cf   :  { %v415_v33 = vadd.f32 %v564_v21, %v414_v32 }
 0x1d0   :  { %732 = vtanh.f32 %v420_v31 }
 0x1d1   :  { %734 = vtanh.f32 %v415_v33  ;;  %v687_v34 = vpop.f32.mrb[6].mxu1 }
 0x1d2   :  { %v725_v35 = vpop.eup %724  ;;  %v430_v36 = vadd.f32 %v687_v34, %v564_v21  ;;  %v424_v37 = vpop.f32.mrb[7].mxu1 }
 0x1d3   :  { %v727_v38 = vpop.eup %726  ;;  %v425_v39 = vadd.f32 %v564_v21, %v424_v37 }
 0x1d4   :  { %490 = vst.msk [vmem:[#allocation3] sm:$0xff] %vm489_vm3, %v727_v38  ;;  %736 = vtanh.f32 %v430_v36 }
 0x1d5   :  { %738 = vtanh.f32 %v425_v39  ;;  %v690_v40 = vpop.f32.mrb[8].mxu1 }
 0x1d6   :  { %v729_v41 = vpop.eup %728  ;;  %v440_v42 = vadd.f32 %v690_v40, %v564_v21  ;;  %v434_v43 = vpop.f32.mrb[9].mxu1 }
 0x1d7   :  { %v731_v44 = vpop.eup %730  ;;  %v435_v45 = vadd.f32 %v564_v21, %v434_v43 }
 0x1d8   :  { %740 = vtanh.f32 %v440_v42 }
 0x1d9   :  { %742 = vtanh.f32 %v435_v45  ;;  %v693_v46 = vpop.f32.mrb[10].mxu1 }
 0x1da   :  { %v733_v47 = vpop.eup %732  ;;  %v450_v48 = vadd.f32 %v693_v46, %v564_v21  ;;  %v444_v49 = vpop.f32.mrb[11].mxu1 }
 0x1db   :  { %v735_v50 = vpop.eup %734  ;;  %v535_v51 = vld [vmem:[#allocation3] sm:$0xff]  ;;  %v445_v52 = vadd.f32 %v564_v21, %v444_v49 }
 0x1dc   :  { %536 = vst [vmem:[%s919_s5] sm:$0xff] %v535_v51  ;;  %744 = vtanh.f32 %v450_v48 }
 0x1dd   :  { %746 = vtanh.f32 %v445_v52  ;;  %v696_v53 = vpop.f32.mrb[12].mxu1 }
 0x1de   :  { %v737_v54 = vpop.eup %736  ;;  %v460_v55 = vadd.f32 %v696_v53, %v564_v21  ;;  %v454_v56 = vpop.f32.mrb[13].mxu1 }
 0x1df   :  { %v739_v57 = vpop.eup %738  ;;  %v455_v58 = vadd.f32 %v564_v21, %v454_v56 }
 0x1e0   :  { %748 = vtanh.f32 %v460_v55 }
 0x1e1   :  { %750 = vtanh.f32 %v455_v58  ;;  %v699_v59 = vpop.f32.mrb[14].mxu1 }
 0x1e2   :  { %v741_v60 = vpop.eup %740  ;;  %v470_v61 = vadd.f32 %v699_v59, %v564_v21  ;;  %v464_v62 = vpop.f32.mrb[15].mxu1 }
 0x1e3   :  { %v743_v63 = vpop.eup %742  ;;  %v465_v0 = vadd.f32 %v564_v21, %v464_v62 }
 0x1e4   :  { %752 = vtanh.f32 %v470_v61 }
 0x1e5   :  { %754 = vtanh.f32 %v465_v0 }
 0x1e6   :  { %v745_v1 = vpop.eup %744 }
 0x1e7   :  { %v747_v2 = vpop.eup %746 }
 0x1ea   :  { %v749_v3 = vpop.eup %748 }
 0x1eb   :  { %v751_v4 = vpop.eup %750 }
 0x1ee   :  { %v753_v5 = vpop.eup %752 }
 0x1ef   :  { %v755_v6 = vpop.eup %754 }

</bundles_post_ra>
